<compile_context>
chip_gen: v7x
topology: tpu7x:2x2x1
jax: 0.10.0
libtpu: 0.0.40
codegen_flags: <defaults>
</compile_context>

<pallas_src>
import functools

import jax
import jax.numpy as jnp
from jax.experimental import pallas as pl
from jax.experimental.pallas import tpu as pltpu


def _round_up(v, m):
    return (v + m - 1) // m * m


def temporal_block_kernel(x_ref, w1_ref, b1_ref, w2_ref, b2_ref, *rest,
                          K, d, pad, HW, L_T, has_downsample):
    """One (batch, time-tile) grid step.

    x_ref  : (Cin, L_T)      bf16  input tile, global times [t0, t0+L_T)
    w1_ref : (K, Cout, Cin)  bf16  conv1 weight, one (Cout, Cin) slab per tap
    b1_ref : (Cout, 1)       f32
    w2_ref : (K, Cout, Cout) bf16
    b2_ref : (Cout, 1)       f32
    rest   : [wd_ref (Cout,Cin), bd_ref (Cout,1)]?, o_ref (Cout, L_T),
             win1_ref (Cin, HW+L_T) bf16, win2_ref (Cout, HW+L_T) bf16

    win1/win2 are persistent carries: columns [HW-pad, HW) hold the `pad`
    samples of x / h1 that precede this tile (written by the previous time
    tile of the same batch row; zeroed at t == 0 == causal zero padding).
    """
    if has_downsample:
        wd_ref, bd_ref, o_ref, win1_ref, win2_ref = rest
    else:
        o_ref, win1_ref, win2_ref = rest

    t = pl.program_id(1)

    # Causal zero padding: reset the carried halo at the start of each batch row.
    @pl.when(t == 0)
    def _():
        win1_ref[:, :HW] = jnp.zeros((win1_ref.shape[0], HW), win1_ref.dtype)
        win2_ref[:, :HW] = jnp.zeros((win2_ref.shape[0], HW), win2_ref.dtype)

    x = x_ref[...]                                   # (Cin, L_T) bf16
    win1_ref[:, HW:] = x                             # lane-aligned (128) store

    # ---- conv1: K dilated taps as K small matmuls, f32 accumulation.
    base = HW - pad                                  # window column of x[t0 - pad]
    acc = jnp.dot(w1_ref[0], win1_ref[:, base:base + L_T],
                  preferred_element_type=jnp.float32)
    for k in range(1, K):
        s = base + k * d
        acc += jnp.dot(w1_ref[k], win1_ref[:, s:s + L_T],
                       preferred_element_type=jnp.float32)
    # h1 rounded to bf16 for the second matmul (intentional precision choice).
    h1 = jnp.maximum(acc + b1_ref[...], 0.0).astype(jnp.bfloat16)
    # Carry the last `pad` input samples for the next tile of this batch row.
    win1_ref[:, HW - pad:HW] = x[:, L_T - pad:]
    # TODO(synk): dropout1/dropout2 treated as identity (inference semantics).

    # ---- conv2 over h1, same structure.
    win2_ref[:, HW:] = h1
    acc = jnp.dot(w2_ref[0], win2_ref[:, base:base + L_T],
                  preferred_element_type=jnp.float32)
    for k in range(1, K):
        s = base + k * d
        acc += jnp.dot(w2_ref[k], win2_ref[:, s:s + L_T],
                       preferred_element_type=jnp.float32)
    out = jnp.maximum(acc + b2_ref[...], 0.0)
    win2_ref[:, HW - pad:HW] = h1[:, L_T - pad:]

    # ---- residual path + final relu.
    if has_downsample:
        res = jnp.dot(wd_ref[...], x,
                      preferred_element_type=jnp.float32) + bd_ref[...]
    else:                                            # Cin == Cout: identity skip
        res = x.astype(jnp.float32)
    o_ref[...] = jnp.maximum(out + res, 0.0).astype(o_ref.dtype)


def temporal_block_pallas(x, params, *, kernel_size, dilation, padding,
                          time_tile=1024, out_dtype=jnp.bfloat16):
    """x: (B, Cin, L) float32, PyTorch NCL layout.  Returns (B, Cout, L).

    Sizing notes per TPU generation:
      * At small channel counts the kernel is HBM/vector-store bound; the MXU
        contraction only fills up when K*C approaches 128 (v5e) / 256
        (v6e, v7x), so wins come from traffic, not matmul restructuring.
      * time_tile >= 512 amortizes per-grid-step overhead; the default 1024
        also fits v7x's 64 MiB-per-core VMEM for C up to ~1k.  An explicit
        vmem_limit_bytes is set (v5e's scoped default is only 16 MiB).
      * Grid is (batch, time) with time sequential (carried halo); batch is
        the "parallel" axis, so on v7x (2 TensorCores) use B >= 2 to keep
        both cores busy.
      * out_dtype defaults to bf16; pass jnp.float32 for the last block of a
        stack if full-precision output is needed.
    """
    assert padding == (kernel_size - 1) * dilation, "causal TCN padding expected"
    w1, b1, w2, b2, wd, bd = params
    B, Cin, L = x.shape
    Cout = w1.shape[0]
    K, d, pad = kernel_size, dilation, padding
    has_downsample = wd is not None
    assert pad >= 1, "kernel_size must be >= 2 for a TCN temporal block"

    # Time tile (lane) sizing: multiples of 128 for lane-dense DMA and stores.
    if L <= time_tile:
        L_T = _round_up(L, 128)
    else:
        assert time_tile % 128 == 0, "time_tile must be a multiple of 128"
        L_T = time_tile
    assert pad <= L_T, "time tile must cover the dilated receptive field"
    T = (L + L_T - 1) // L_T
    Lr = T * L_T
    HW = _round_up(pad, 128)          # 128-aligned head of the carried window

    x_bf = x.astype(jnp.bfloat16)
    if Lr != L:
        # Right-pad so time splits into T full tiles; cropped again below.
        # (Accepting an Lr-length output downstream would avoid both passes.)
        x_bf = jnp.pad(x_bf, ((0, 0), (0, 0), (0, Lr - L)))

    # Per-tap weight slabs (K, Cout, C): taps indexed on a free leading axis,
    # so no lane-misaligned weight slicing inside the kernel loop.
    w1_t = jnp.transpose(w1, (2, 0, 1)).astype(jnp.bfloat16)     # (K, Cout, Cin)
    w2_t = jnp.transpose(w2, (2, 0, 1)).astype(jnp.bfloat16)     # (K, Cout, Cout)
    b1_c = b1.reshape(Cout, 1).astype(jnp.float32)
    b2_c = b2.reshape(Cout, 1).astype(jnp.float32)

    in_specs = [
        pl.BlockSpec((None, Cin, L_T), lambda b, t: (b, 0, t)),
        pl.BlockSpec((K, Cout, Cin), lambda b, t: (0, 0, 0)),
        pl.BlockSpec((Cout, 1), lambda b, t: (0, 0)),
        pl.BlockSpec((K, Cout, Cout), lambda b, t: (0, 0, 0)),
        pl.BlockSpec((Cout, 1), lambda b, t: (0, 0)),
    ]
    args = [x_bf, w1_t, b1_c, w2_t, b2_c]
    if has_downsample:
        in_specs += [pl.BlockSpec((Cout, Cin), lambda b, t: (0, 0)),
                     pl.BlockSpec((Cout, 1), lambda b, t: (0, 0))]
        args += [wd.astype(jnp.bfloat16),
                 bd.reshape(Cout, 1).astype(jnp.float32)]

    kernel = functools.partial(temporal_block_kernel, K=K, d=d, pad=pad,
                               HW=HW, L_T=L_T, has_downsample=has_downsample)

    # Rough VMEM budget (double-buffered tiles + persistent windows + weights)
    # used to set an explicit scoped-VMEM limit, capped at v7x's 64 MiB.
    out_itemsize = jnp.dtype(out_dtype).itemsize
    x_tile = _round_up(Cin, 16) * L_T * 2
    o_tile = _round_up(Cout, 16) * L_T * out_itemsize
    win_b = (_round_up(Cin, 16) + _round_up(Cout, 16)) * _round_up(HW + L_T, 128) * 2
    vmem_need = 2 * (x_tile + o_tile) + win_b + (2 << 20)
    vmem_limit = int(min(max(2 * vmem_need, 32 << 20), 64 << 20))

    flops = 2 * B * Lr * Cout * (K * Cin + K * Cout
                                 + (Cin if has_downsample else 0))
    bytes_accessed = (2 * B * Cin * Lr + out_itemsize * B * Cout * Lr
                      + 2 * K * Cout * (Cin + Cout) + 8 * Cout
                      + ((2 * Cout * Cin + 4 * Cout) if has_downsample else 0))

    out = pl.pallas_call(
        kernel,
        out_shape=jax.ShapeDtypeStruct((B, Cout, Lr), out_dtype),
        grid_spec=pltpu.PrefetchScalarGridSpec(
            num_scalar_prefetch=0,
            grid=(B, T),
            in_specs=in_specs,
            out_specs=pl.BlockSpec((None, Cout, L_T), lambda b, t: (b, 0, t)),
            scratch_shapes=[
                pltpu.VMEM((Cin, HW + L_T), jnp.bfloat16),    # carried x window
                pltpu.VMEM((Cout, HW + L_T), jnp.bfloat16),   # carried h1 window
            ],
        ),
        # Time carries state tile-to-tile -> "arbitrary"; batch shards across
        # cores on v7x ("parallel").
        compiler_params=pltpu.CompilerParams(
            dimension_semantics=("parallel", "arbitrary"),
            vmem_limit_bytes=vmem_limit),
        cost_estimate=pl.CostEstimate(flops=int(flops), transcendentals=0,
                                      bytes_accessed=int(bytes_accessed)),
    )(*args)

    return out[:, :, :L] if Lr != L else out


def init_params(key, n_inputs, n_outputs, kernel_size):
    """Effective (weight-norm folded) parameters in PyTorch layouts.

    conv weights (Cout, Cin, K); weight_norm w = g * v/||v|| with per-output-
    channel norms and g initialized to ||v|| (so w == v at init; formula kept
    explicit).  wd/bd are None when n_inputs == n_outputs (no downsample).
    """
    kv1, kv2, kvd, kb1, kb2, kbd = jax.random.split(key, 6)

    def wn(v):                                   # v: (Cout, Cin, K)
        nrm = jnp.sqrt(jnp.sum(v * v, axis=(1, 2), keepdims=True))
        g = nrm
        return g * v / nrm

    v1 = 0.01 * jax.random.normal(kv1, (n_outputs, n_inputs, kernel_size), jnp.float32)
    v2 = 0.01 * jax.random.normal(kv2, (n_outputs, n_outputs, kernel_size), jnp.float32)
    w1 = wn(v1)
    w2 = wn(v2)

    bnd1 = 1.0 / jnp.sqrt(n_inputs * kernel_size)
    bnd2 = 1.0 / jnp.sqrt(n_outputs * kernel_size)
    b1 = jax.random.uniform(kb1, (n_outputs,), jnp.float32, -bnd1, bnd1)
    b2 = jax.random.uniform(kb2, (n_outputs,), jnp.float32, -bnd2, bnd2)

    if n_inputs != n_outputs:
        wd = 0.01 * jax.random.normal(kvd, (n_outputs, n_inputs), jnp.float32)
        bd = jax.random.uniform(kbd, (n_outputs,), jnp.float32,
                                -1.0 / jnp.sqrt(n_inputs), 1.0 / jnp.sqrt(n_inputs))
    else:
        wd, bd = None, None
    return (w1, b1, w2, b2, wd, bd)


def temporal_block_ref(x, params, *, kernel_size, dilation, padding):
    """Pure-JAX f32 reference of the same math (NCL layout), for validation."""
    w1, b1, w2, b2, wd, bd = params
    K, d, pad = kernel_size, dilation, padding
    B, Cin, L = x.shape

    def causal_conv(inp, w, b):                  # inp (B,C,L), w (Cout,C,K)
        Co = w.shape[0]
        xp = jnp.pad(inp, ((0, 0), (0, 0), (pad, 0)))
        out = jnp.broadcast_to(b[None, :, None], (B, Co, L)).astype(jnp.float32)
        for k in range(K):
            out = out + jnp.einsum('bcl,oc->bol',
                                   xp[:, :, k * d:k * d + L], w[:, :, k])
        return out

    h1 = jax.nn.relu(causal_conv(x, w1, b1))
    h2 = jax.nn.relu(causal_conv(h1, w2, b2))
    if wd is not None:
        res = jnp.einsum('bcl,oc->bol', x, wd) + bd[None, :, None]
    else:
        res = x
    return jax.nn.relu(h2 + res)


if __name__ == "__main__":
    def run_case(name, B, Cin, Cout, L, K, dilation, time_tile, out_dtype, tol):
        padding = (K - 1) * dilation
        key = jax.random.PRNGKey(0)
        kx, kp = jax.random.split(key)
        x = jax.random.normal(kx, (B, Cin, L), jnp.float32)
        params = init_params(kp, Cin, Cout, K)

        y = temporal_block_pallas(x, params, kernel_size=K, dilation=dilation,
                                  padding=padding, time_tile=time_tile,
                                  out_dtype=out_dtype)
        y = jax.block_until_ready(y)
        assert y.shape == (B, Cout, L), (name, y.shape)
        assert y.dtype == jnp.dtype(out_dtype), (name, y.dtype)

        # Reference in f32 on the same bf16-rounded inputs the kernel consumes,
        # so the comparison tightly validates the conv / carry / residual math.
        rb = lambda a: a.astype(jnp.bfloat16).astype(jnp.float32)
        w1, b1, w2, b2, wd, bd = params
        params_r = (rb(w1), b1, rb(w2), b2,
                    None if wd is None else rb(wd), bd)
        y_ref = temporal_block_ref(rb(x), params_r, kernel_size=K,
                                   dilation=dilation, padding=padding)
        yf = y.astype(jnp.float32)
        err = float(jnp.max(jnp.abs(yf - y_ref)))
        assert jnp.allclose(yf, y_ref, atol=tol, rtol=tol), (
            f"{name}: mismatch vs JAX reference (max abs err {err})")

    # TemporalBlock(4, 8, kernel_size=3, stride=1, dilation=2, padding=4):
    # downsample residual, 3 time tiles -> exercises the carried dilated halo.
    run_case("downsample", B=2, Cin=4, Cout=8, L=384, K=3, dilation=2,
             time_tile=128, out_dtype=jnp.float32, tol=2e-3)
    # TemporalBlock(8, 8, kernel_size=2, stride=1, dilation=1, padding=1):
    # identity residual, ragged L (pad/crop path), bf16 output.
    run_case("identity_residual", B=2, Cin=8, Cout=8, L=200, K=2, dilation=1,
             time_tile=128, out_dtype=jnp.bfloat16, tol=2e-2)
    # Larger dilation, B=1, 256-wide tiles, bf16 output.
    run_case("dilated", B=1, Cin=4, Cout=8, L=600, K=3, dilation=4,
             time_tile=256, out_dtype=jnp.bfloat16, tol=2e-2)

    print("KERNEL_OK")
</pallas_src>

<mosaic_0001>
module attributes {stable_mosaic.version = 11 : i64} {
  func.func @temporal_block_kernel(%arg0: i32, %arg1: i32, %arg2: memref<1x4x128xbf16, #tpu.memory_space<vmem>>, %arg3: memref<3x8x4xbf16, #tpu.memory_space<vmem>>, %arg4: memref<8x1xf32, #tpu.memory_space<vmem>>, %arg5: memref<3x8x8xbf16, #tpu.memory_space<vmem>>, %arg6: memref<8x1xf32, #tpu.memory_space<vmem>>, %arg7: memref<8x4xbf16, #tpu.memory_space<vmem>>, %arg8: memref<8x1xf32, #tpu.memory_space<vmem>>, %arg9: memref<1x8x128xf32, #tpu.memory_space<vmem>>, %arg10: memref<4x256xbf16, #tpu.memory_space<vmem>>, %arg11: memref<8x256xbf16, #tpu.memory_space<vmem>>) attributes {dimension_semantics = [#tpu.dimension_semantics<parallel>, #tpu.dimension_semantics<arbitrary>], iteration_bounds = array<i64: 2, 3>, scalar_prefetch = 0 : i64, scratch_operands = 2 : i64, tpu.core_type = #tpu.core_type<tc>, window_params = [{transform_indices = @transform_0, window_bounds = array<i64: 1, 4, 128>}, {pipeline_mode = #tpu.pipeline_mode<synchronous>, transform_indices = @transform_1, window_bounds = array<i64: 3, 8, 4>}, {pipeline_mode = #tpu.pipeline_mode<synchronous>, transform_indices = @transform_2, window_bounds = array<i64: 8, 1>}, {pipeline_mode = #tpu.pipeline_mode<synchronous>, transform_indices = @transform_3, window_bounds = array<i64: 3, 8, 8>}, {pipeline_mode = #tpu.pipeline_mode<synchronous>, transform_indices = @transform_4, window_bounds = array<i64: 8, 1>}, {pipeline_mode = #tpu.pipeline_mode<synchronous>, transform_indices = @transform_5, window_bounds = array<i64: 8, 4>}, {pipeline_mode = #tpu.pipeline_mode<synchronous>, transform_indices = @transform_6, window_bounds = array<i64: 8, 1>}, {transform_indices = @transform_7, window_bounds = array<i64: 1, 8, 128>}]} {
    %c0_i32 = arith.constant 0 : i32
    %0 = arith.cmpi eq, %arg1, %c0_i32 : i32
    %1 = arith.extui %0 : i1 to i32
    %c0_i32_0 = arith.constant 0 : i32
    %2 = arith.cmpi ne, %1, %c0_i32_0 : i32
    scf.if %2 {
      %cst_56 = arith.constant 0.000000e+00 : bf16
      %61 = vector.broadcast %cst_56 : bf16 to vector<4x128xbf16>
      %c0_57 = arith.constant 0 : index
      %c0_58 = arith.constant 0 : index
      %62 = vector.load %arg10[%c0_57, %c0_58] : memref<4x256xbf16, #tpu.memory_space<vmem>>, vector<4x128xbf16>
      tpu.vector_store %arg10[%c0_57, %c0_58], %61 {strides = array<i32>} : memref<4x256xbf16, #tpu.memory_space<vmem>>, vector<4x128xbf16>,
      %cst_59 = arith.constant 0.000000e+00 : bf16
      %63 = vector.broadcast %cst_59 : bf16 to vector<8x128xbf16>
      %c0_60 = arith.constant 0 : index
      %c0_61 = arith.constant 0 : index
      %64 = vector.load %arg11[%c0_60, %c0_61] : memref<8x256xbf16, #tpu.memory_space<vmem>>, vector<8x128xbf16>
      tpu.vector_store %arg11[%c0_60, %c0_61], %63 {strides = array<i32>} : memref<8x256xbf16, #tpu.memory_space<vmem>>, vector<8x128xbf16>,
    } else {
    }
    %c0 = arith.constant 0 : index
    %c0_1 = arith.constant 0 : index
    %c0_2 = arith.constant 0 : index
    %3 = vector.load %arg2[%c0, %c0_1, %c0_2] : memref<1x4x128xbf16, #tpu.memory_space<vmem>>, vector<1x4x128xbf16>
    %4 = vector.shape_cast %3 : vector<1x4x128xbf16> to vector<4x128xbf16>
    %c0_3 = arith.constant 0 : index
    %c128 = arith.constant 128 : index
    %5 = vector.load %arg10[%c0_3, %c128] : memref<4x256xbf16, #tpu.memory_space<vmem>>, vector<4x128xbf16>
    tpu.vector_store %arg10[%c0_3, %c128], %4 {strides = array<i32>} : memref<4x256xbf16, #tpu.memory_space<vmem>>, vector<4x128xbf16>,
    %c0_4 = arith.constant 0 : index
    %c0_5 = arith.constant 0 : index
    %c0_6 = arith.constant 0 : index
    %6 = vector.load %arg3[%c0_4, %c0_5, %c0_6] : memref<3x8x4xbf16, #tpu.memory_space<vmem>>, vector<1x8x4xbf16>
    %7 = vector.shape_cast %6 : vector<1x8x4xbf16> to vector<8x4xbf16>
    %c0_7 = arith.constant 0 : index
    %c124 = arith.constant 124 : index
    %8 = vector.load %arg10[%c0_7, %c124] : memref<4x256xbf16, #tpu.memory_space<vmem>>, vector<4x128xbf16>
    %cst = arith.constant dense<0.000000e+00> : vector<8x128xf32>
    %9 = tpu.matmul %7, %8, %cst {dimension_numbers = #tpu.dot_dimension_numbers<[1], [0], [0], [1], [0, 0, 1, 1], [], []>} : vector<8x4xbf16>, vector<4x128xbf16>, vector<8x128xf32> -> vector<8x128xf32>
    %c1 = arith.constant 1 : index
    %c0_8 = arith.constant 0 : index
    %c0_9 = arith.constant 0 : index
    %10 = vector.load %arg3[%c1, %c0_8, %c0_9] : memref<3x8x4xbf16, #tpu.memory_space<vmem>>, vector<1x8x4xbf16>
    %11 = vector.shape_cast %10 : vector<1x8x4xbf16> to vector<8x4xbf16>
    %c0_10 = arith.constant 0 : index
    %c126 = arith.constant 126 : index
    %12 = vector.load %arg10[%c0_10, %c126] : memref<4x256xbf16, #tpu.memory_space<vmem>>, vector<4x128xbf16>
    %cst_11 = arith.constant dense<0.000000e+00> : vector<8x128xf32>
    %13 = tpu.matmul %11, %12, %cst_11 {dimension_numbers = #tpu.dot_dimension_numbers<[1], [0], [0], [1], [0, 0, 1, 1], [], []>} : vector<8x4xbf16>, vector<4x128xbf16>, vector<8x128xf32> -> vector<8x128xf32>
    %14 = arith.addf %9, %13 : vector<8x128xf32>
    %c2 = arith.constant 2 : index
    %c0_12 = arith.constant 0 : index
    %c0_13 = arith.constant 0 : index
    %15 = vector.load %arg3[%c2, %c0_12, %c0_13] : memref<3x8x4xbf16, #tpu.memory_space<vmem>>, vector<1x8x4xbf16>
    %16 = vector.shape_cast %15 : vector<1x8x4xbf16> to vector<8x4xbf16>
    %c0_14 = arith.constant 0 : index
    %c128_15 = arith.constant 128 : index
    %17 = vector.load %arg10[%c0_14, %c128_15] : memref<4x256xbf16, #tpu.memory_space<vmem>>, vector<4x128xbf16>
    %cst_16 = arith.constant dense<0.000000e+00> : vector<8x128xf32>
    %18 = tpu.matmul %16, %17, %cst_16 {dimension_numbers = #tpu.dot_dimension_numbers<[1], [0], [0], [1], [0, 0, 1, 1], [], []>} : vector<8x4xbf16>, vector<4x128xbf16>, vector<8x128xf32> -> vector<8x128xf32>
    %19 = arith.addf %14, %18 : vector<8x128xf32>
    %c0_17 = arith.constant 0 : index
    %c0_18 = arith.constant 0 : index
    %20 = vector.load %arg4[%c0_17, %c0_18] : memref<8x1xf32, #tpu.memory_space<vmem>>, vector<8x1xf32>
    %21 = vector.broadcast %20 : vector<8x1xf32> to vector<8x128xf32>
    %22 = arith.addf %19, %21 : vector<8x128xf32>
    %cst_19 = arith.constant 0.000000e+00 : f32
    %23 = vector.broadcast %cst_19 : f32 to vector<8x128xf32>
    %24 = arith.maximumf %22, %23 : vector<8x128xf32>
    %25 = arith.truncf %24 : vector<8x128xf32> to vector<8x128xbf16>
    %26 = vector.extract_strided_slice %4 {offsets = [0, 124], sizes = [4, 4], strides = [1, 1]} : vector<4x128xbf16> to vector<4x4xbf16>
    %c0_20 = arith.constant 0 : index
    %c124_21 = arith.constant 124 : index
    %27 = vector.load %arg10[%c0_20, %c124_21] : memref<4x256xbf16, #tpu.memory_space<vmem>>, vector<4x4xbf16>
    tpu.vector_store %arg10[%c0_20, %c124_21], %26 {strides = array<i32>} : memref<4x256xbf16, #tpu.memory_space<vmem>>, vector<4x4xbf16>,
    %c0_22 = arith.constant 0 : index
    %c128_23 = arith.constant 128 : index
    %28 = vector.load %arg11[%c0_22, %c128_23] : memref<8x256xbf16, #tpu.memory_space<vmem>>, vector<8x128xbf16>
    tpu.vector_store %arg11[%c0_22, %c128_23], %25 {strides = array<i32>} : memref<8x256xbf16, #tpu.memory_space<vmem>>, vector<8x128xbf16>,
    %c0_24 = arith.constant 0 : index
    %c0_25 = arith.constant 0 : index
    %c0_26 = arith.constant 0 : index
    %29 = vector.load %arg5[%c0_24, %c0_25, %c0_26] : memref<3x8x8xbf16, #tpu.memory_space<vmem>>, vector<1x8x8xbf16>
    %30 = vector.shape_cast %29 : vector<1x8x8xbf16> to vector<8x8xbf16>
    %c0_27 = arith.constant 0 : index
    %c124_28 = arith.constant 124 : index
    %31 = vector.load %arg11[%c0_27, %c124_28] : memref<8x256xbf16, #tpu.memory_space<vmem>>, vector<8x128xbf16>
    %cst_29 = arith.constant dense<0.000000e+00> : vector<8x128xf32>
    %32 = tpu.matmul %30, %31, %cst_29 {dimension_numbers = #tpu.dot_dimension_numbers<[1], [0], [0], [1], [0, 0, 1, 1], [], []>} : vector<8x8xbf16>, vector<8x128xbf16>, vector<8x128xf32> -> vector<8x128xf32>
    %c1_30 = arith.constant 1 : index
    %c0_31 = arith.constant 0 : index
    %c0_32 = arith.constant 0 : index
    %33 = vector.load %arg5[%c1_30, %c0_31, %c0_32] : memref<3x8x8xbf16, #tpu.memory_space<vmem>>, vector<1x8x8xbf16>
    %34 = vector.shape_cast %33 : vector<1x8x8xbf16> to vector<8x8xbf16>
    %c0_33 = arith.constant 0 : index
    %c126_34 = arith.constant 126 : index
    %35 = vector.load %arg11[%c0_33, %c126_34] : memref<8x256xbf16, #tpu.memory_space<vmem>>, vector<8x128xbf16>
    %cst_35 = arith.constant dense<0.000000e+00> : vector<8x128xf32>
    %36 = tpu.matmul %34, %35, %cst_35 {dimension_numbers = #tpu.dot_dimension_numbers<[1], [0], [0], [1], [0, 0, 1, 1], [], []>} : vector<8x8xbf16>, vector<8x128xbf16>, vector<8x128xf32> -> vector<8x128xf32>
    %37 = arith.addf %32, %36 : vector<8x128xf32>
    %c2_36 = arith.constant 2 : index
    %c0_37 = arith.constant 0 : index
    %c0_38 = arith.constant 0 : index
    %38 = vector.load %arg5[%c2_36, %c0_37, %c0_38] : memref<3x8x8xbf16, #tpu.memory_space<vmem>>, vector<1x8x8xbf16>
    %39 = vector.shape_cast %38 : vector<1x8x8xbf16> to vector<8x8xbf16>
    %c0_39 = arith.constant 0 : index
    %c128_40 = arith.constant 128 : index
    %40 = vector.load %arg11[%c0_39, %c128_40] : memref<8x256xbf16, #tpu.memory_space<vmem>>, vector<8x128xbf16>
    %cst_41 = arith.constant dense<0.000000e+00> : vector<8x128xf32>
    %41 = tpu.matmul %39, %40, %cst_41 {dimension_numbers = #tpu.dot_dimension_numbers<[1], [0], [0], [1], [0, 0, 1, 1], [], []>} : vector<8x8xbf16>, vector<8x128xbf16>, vector<8x128xf32> -> vector<8x128xf32>
    %42 = arith.addf %37, %41 : vector<8x128xf32>
    %c0_42 = arith.constant 0 : index
    %c0_43 = arith.constant 0 : index
    %43 = vector.load %arg6[%c0_42, %c0_43] : memref<8x1xf32, #tpu.memory_space<vmem>>, vector<8x1xf32>
    %44 = vector.broadcast %43 : vector<8x1xf32> to vector<8x128xf32>
    %45 = arith.addf %42, %44 : vector<8x128xf32>
    %cst_44 = arith.constant 0.000000e+00 : f32
    %46 = vector.broadcast %cst_44 : f32 to vector<8x128xf32>
    %47 = arith.maximumf %45, %46 : vector<8x128xf32>
    %48 = vector.extract_strided_slice %25 {offsets = [0, 124], sizes = [8, 4], strides = [1, 1]} : vector<8x128xbf16> to vector<8x4xbf16>
    %c0_45 = arith.constant 0 : index
    %c124_46 = arith.constant 124 : index
    %49 = vector.load %arg11[%c0_45, %c124_46] : memref<8x256xbf16, #tpu.memory_space<vmem>>, vector<8x4xbf16>
    tpu.vector_store %arg11[%c0_45, %c124_46], %48 {strides = array<i32>} : memref<8x256xbf16, #tpu.memory_space<vmem>>, vector<8x4xbf16>,
    %c0_47 = arith.constant 0 : index
    %c0_48 = arith.constant 0 : index
    %50 = vector.load %arg7[%c0_47, %c0_48] : memref<8x4xbf16, #tpu.memory_space<vmem>>, vector<8x4xbf16>
    %cst_49 = arith.constant dense<0.000000e+00> : vector<8x128xf32>
    %51 = tpu.matmul %50, %4, %cst_49 {dimension_numbers = #tpu.dot_dimension_numbers<[1], [0], [0], [1], [0, 0, 1, 1], [], []>} : vector<8x4xbf16>, vector<4x128xbf16>, vector<8x128xf32> -> vector<8x128xf32>
    %c0_50 = arith.constant 0 : index
    %c0_51 = arith.constant 0 : index
    %52 = vector.load %arg8[%c0_50, %c0_51] : memref<8x1xf32, #tpu.memory_space<vmem>>, vector<8x1xf32>
    %53 = vector.broadcast %52 : vector<8x1xf32> to vector<8x128xf32>
    %54 = arith.addf %51, %53 : vector<8x128xf32>
    %55 = arith.addf %47, %54 : vector<8x128xf32>
    %cst_52 = arith.constant 0.000000e+00 : f32
    %56 = vector.broadcast %cst_52 : f32 to vector<8x128xf32>
    %57 = arith.maximumf %55, %56 : vector<8x128xf32>
    %c0_53 = arith.constant 0 : index
    %c0_54 = arith.constant 0 : index
    %c0_55 = arith.constant 0 : index
    %58 = vector.load %arg9[%c0_53, %c0_54, %c0_55] : memref<1x8x128xf32, #tpu.memory_space<vmem>>, vector<1x8x128xf32>
    %59 = vector.shape_cast %58 : vector<1x8x128xf32> to vector<8x128xf32>
    %60 = vector.shape_cast %57 : vector<8x128xf32> to vector<1x8x128xf32>
    tpu.vector_store %arg9[%c0_53, %c0_54, %c0_55], %60 {strides = array<i32>} : memref<1x8x128xf32, #tpu.memory_space<vmem>>, vector<1x8x128xf32>,
    return
  }
  func.func @transform_0(%arg0: i32, %arg1: i32) -> (i32, i32, i32) {
    %c0_i32 = arith.constant 0 : i32
    %c0_i32_0 = arith.constant 0 : i32
    return %arg0, %c0_i32, %arg1 : i32, i32, i32
  }
  func.func @transform_1(%arg0: i32, %arg1: i32) -> (i32, i32, i32) {
    %c0_i32 = arith.constant 0 : i32
    %c0_i32_0 = arith.constant 0 : i32
    %c0_i32_1 = arith.constant 0 : i32
    %c0_i32_2 = arith.constant 0 : i32
    return %c0_i32, %c0_i32_0, %c0_i32_1 : i32, i32, i32
  }
  func.func @transform_2(%arg0: i32, %arg1: i32) -> (i32, i32) {
    %c0_i32 = arith.constant 0 : i32
    %c0_i32_0 = arith.constant 0 : i32
    %c0_i32_1 = arith.constant 0 : i32
    return %c0_i32, %c0_i32_0 : i32, i32
  }
  func.func @transform_3(%arg0: i32, %arg1: i32) -> (i32, i32, i32) {
    %c0_i32 = arith.constant 0 : i32
    %c0_i32_0 = arith.constant 0 : i32
    %c0_i32_1 = arith.constant 0 : i32
    %c0_i32_2 = arith.constant 0 : i32
    return %c0_i32, %c0_i32_0, %c0_i32_1 : i32, i32, i32
  }
  func.func @transform_4(%arg0: i32, %arg1: i32) -> (i32, i32) {
    %c0_i32 = arith.constant 0 : i32
    %c0_i32_0 = arith.constant 0 : i32
    %c0_i32_1 = arith.constant 0 : i32
    return %c0_i32, %c0_i32_0 : i32, i32
  }
  func.func @transform_5(%arg0: i32, %arg1: i32) -> (i32, i32) {
    %c0_i32 = arith.constant 0 : i32
    %c0_i32_0 = arith.constant 0 : i32
    %c0_i32_1 = arith.constant 0 : i32
    return %c0_i32, %c0_i32_0 : i32, i32
  }
  func.func @transform_6(%arg0: i32, %arg1: i32) -> (i32, i32) {
    %c0_i32 = arith.constant 0 : i32
    %c0_i32_0 = arith.constant 0 : i32
    %c0_i32_1 = arith.constant 0 : i32
    return %c0_i32, %c0_i32_0 : i32, i32
  }
  func.func @transform_7(%arg0: i32, %arg1: i32) -> (i32, i32, i32) {
    %c0_i32 = arith.constant 0 : i32
    %c0_i32_0 = arith.constant 0 : i32
    return %arg0, %c0_i32, %arg1 : i32, i32, i32
  }
}

</mosaic_0001>

<bundles_post_ra>
// kernel: tpu_custom_call.1
= control target key start
LH: loop header
LB: loop body
LE: loop exit
PB: predicated region body
PF: predicated region fallthrough
CT: control target
= control target key end

     0   :  { %12 = vsyncpa [#allocation5], 0  ;;  %s1349_s0 = inlined_call_operand.vmem [shape: bf16[2,4,384], index: 0, kind: input, shape index: {}]   ;;  %s1350_s1 = inlined_call_operand.vmem [shape: bf16[3,8,4], index: 1, kind: input, shape index: {}]   ;;  %s1351_s2 = inlined_call_operand.vmem [shape: f32[8,1], index: 2, kind: input, shape index: {}]   ;;  %s1352_s3 = inlined_call_operand.vmem [shape: bf16[3,8,8], index: 3, kind: input, shape index: {}]   ;;  %s1353_s4 = inlined_call_operand.vmem [shape: f32[8,1], index: 4, kind: input, shape index: {}]   ;;  %s1354_s5 = inlined_call_operand.vmem [shape: bf16[8,4], index: 5, kind: input, shape index: {}]   ;;  %s1355_s6 = inlined_call_operand.vmem [shape: f32[8,1], index: 6, kind: input, shape index: {}]   ;;  %s1356_s7 = inlined_call_operand.hbm [shape: f32[2,8,384], index: 7, kind: output, shape index: {}]  }
   0x1   :  { %14 = vsyncpa [#allocation5 + $0x1], 0  ;;  %s1121_s24 = smov 0   ;;  %s1123_s25 = smov 0  }
   0x2   :  { %s1125_s26 = smov 0   ;;  %s1127_s27 = smov 0  }
   0x3   :  { %s1129_s28 = smov 0   ;;  %s1131_s29 = smov 0  }
   0x4   :  { %s1133_s30 = smov 0   ;;  %s1135_s8 = smov 0  }
   0x5 LB: > { %s815_s9 = sadd.s32 4294967295, %s1072_s8   ;;  %s816_s10 = sadd.s32 4294967294, %s1072_s8   ;;  %s1072_s8 = sphi %s1135_s8, %s20_s8   ;;  %s1068_s30 = sphi %s1133_s30, %s1368_s30   ;;  %s1064_s29 = sphi %s1131_s29, %s1367_s29   ;;  %s1060_s28 = sphi %s1129_s28, %s1366_s28   ;;  %s1056_s27 = sphi %s1127_s27, %s1365_s27   ;;  %s1052_s26 = sphi %s1125_s26, %s1364_s26   ;;  %s1048_s25 = sphi %s1123_s25, %s1363_s25   ;;  %s1044_s24 = sphi %s1121_s24, %s1362_s24  }
   0x6   : > { %s29_s11 = sadd.s32 1, %s1064_s29  ;;  %s32_s12 = sadd.s32 1, %s1068_s30 }
   0x7   : > { %p30_p0 = scmp.ge.s32.totalorder %s29_s11, 3  ;;  %p205_p1 = scmp.ne.s32.totalorder %s1052_s26, %s1048_s25 }
   0x8   : > { %p206_p2 = scmp.eq.s32.totalorder %s815_s9, 5  ;;  %p211_p5 = scmp.ne.s32.totalorder %s1048_s25, %s1044_s24 }
   0x9   : > { %s1370_s11 = smov (%p30_p0, %s29_s11), 0  ;;  %s1372_s12 = smov (!%p30_p0, %s32_s12), %s1068_s30 }
   0xa   : > { %s191_s13 = ssub.s32 %s1064_s29, %s1370_s11  ;;  %p1172_p3 = por %p206_p2, %p205_p1 }
   0xb   : > { %p34_p4 = scmp.ge.s32.totalorder %s1372_s12, 2  ;;  %p212_p6 = scmp.eq.s32.totalorder %s816_s10, 5 }
   0xc   : > { %p819_p7 = scmp.ge.s32.totalorder %s1072_s8, 1  ;;  %p259_p9 = scmp.lt.s32.totalorder %s1072_s8, 7 }
   0xd   : > { %s1374_s12 = smov (%p34_p4, %s1372_s12), 0  ;;  %p1181_p8 = por %p212_p6, %p211_p5 }
   0xe   : > { %1359 = sst [smem:[#allocation7_spill]] %s1374_s12  ;;  %s190_s16 = ssub.s32 %s1068_s30, %s1374_s12 }
   0xf   : > { %s195_s17 = sadd.s32 1, %s1052_s26  ;;  %s192_s18 = sor.u32 %s191_s13, %s190_s16 }
  0x10   : > { %p260_p10 = pnand %p819_p7, %p259_p9  ;;  %p193_p11 = scmp.eq.s32.totalorder %s192_s18, 0 }
  0x11   : > { %s291_s20 = sand.u32 (!%p260_p10), 1, %s1048_s25   ;;  %p294_p12 = scmp.lt.s32.totalorder (!%p260_p10), %s1060_s28, 1 }
  0x12   : > { %s1190_s19 = scalar_select %p193_p11, %s1052_s26, %s195_s17  }
  0x13   : > { %263 = sbr.rel (%p260_p10) target bundleno = 775 (0x307), region = 48  ;;  %s1196_s21 = sshll.u32 (!%p260_p10), %s291_s20, 3 }
  0x14   : > { %p296_p13 = scmp.lt.s32.totalorder (!%p260_p10), %s1056_s27, 2  ;;  %s293_s12 = scalar_lea.vmem (!%p260_p10), [#allocation4], %s1196_s21 }
  0x15   : > { %p822_p0 = scmp.ne.s32.totalorder (!%p260_p10), %s1056_s27, 0 }
  0x1a   : > { %s295_s22 = scalar_select %p294_p12, %s1060_s28, 1 }
  0x1b   : > { %s297_s23 = scalar_select %p296_p13, %s1056_s27, 2 }
  0x1c   : > { %s897_s9 = smul.u32 3, %s295_s22  ;;  %v1074_v0 = vmov (!%p822_p0), 0  }
  0x1d   : > { %306 = sbr.rel (%p822_p0) target bundleno = 36 (0x24), region = 52  ;;  %307 = vst [vmem:[#allocation2] sm:$0x3] (!%p822_p0), %v1074_v0  ;;  %308 = vst [vmem:[#allocation3] sm:$0xf] (!%p822_p0), %v1074_v0 }
  0x1e   : > { %s299_s10 = sadd.s32 %s897_s9, %s297_s23 }
  0x1f   : > { %s821_s13 = sshll.u32 %s299_s10, 1 }
  0x20   : > { %s301_s18 = scalar_lea.vmem %s1349_s0, %s821_s13 }
  0x24 PF: > { %v1206_v1 = vld [vmem:[%s301_s18] sm:$0x3]  ;;  %v1075_v2 = vmov 0.0   ;;  %vm1076_vm0 = vmmov 0   ;;  %vm489_vm1 = vcmask 1042400   ;;  %s1077_s22 = smov 4  }
  0x25   : > { %310 = vst [vmem:[#allocation2 + $0x2] sm:$0x3] %v1206_v1  ;;  %855 = vmatprep.subr.bf16.mxu0 %v1075_v2  ;;  %861 = vmatprep.subr.bf16.mxu1 %v1075_v2  ;;  %s1078_s23 = smov 2   ;;  %v1079_v5 = vmov 0   ;;  %v480_v6 = vld [vmem:[%s1351_s2] sm:$0xff]  ;;  %vm328_vm2 = vcmask 15360  }
  0x26   : > { %857 = vmatprep.mubr.msk.bf16.mxu0 %vm1076_vm0, %v1075_v2  ;;  %863 = vmatprep.mubr.msk.bf16.mxu1 %vm1076_vm0, %v1075_v2  ;;  %vm330_vm3 = vcmask 31744   ;;  %vm334_vm4 = vcmask 1041408   ;;  %v823_v16 = vld [vmem:[%s1350_s1 + $0x4] sm:$0xf]  ;;  %v311_v17 = vld [vmem:[%s1350_s1] sm:$0xf] }
  0x27   : > { %976 = vset.pattern.permute.xlu0 %v1079_v5  ;;  %977 = vset.pattern.permute.xlu1 %v1079_v5  ;;  %v827_v19 = vld [vmem:[%s1350_s1 + $0x8] sm:$0xf]  ;;  %vm663_vm5 = vcmask 1044448   ;;  %v655_v40 = vld [vmem:[%s1353_s4] sm:$0xff]  ;;  %vm510_vm6 = vcmask 1043456   ;;  %vm506_vm7 = vcmask 64512  }
  0x28   : > { %v666_v42 = vld [vmem:[%s1355_s6] sm:$0xff]  ;;  %v676_v55 = vsel %vm334_vm4, %v1206_v1, 0  ;;  %v834_v56 = vld [vmem:[%s1352_s3 + $0x8] sm:$0xf]  ;;  %s898_s9 = smul.u32 3, %s1060_s28  ;;  %s737_s28 = sshll.u32 %s293_s12, 4  ;;  %s1294_s28 = int_to_ptr.vmem [resolvable:$true] %s737_s28 }
  0x29   : > { %v829_v47 = vld [vmem:[%s1352_s3 + $0x4] sm:$0xf]  ;;  %v492_v54 = vld [vmem:[%s1352_s3] sm:$0xf]  ;;  %s978_s17 = scalar_lea.vmem %s1294_s28, 128  ;;  %s1080_s18 = smov [#allocation4]  }
  0x2a   : > { %v665_v57 = vld [vmem:[%s1354_s5] sm:$0xf]  ;;  %s733_s10 = sadd.s32 %s1056_s27, %s898_s9  ;;  %s722_s27 = scalar_lea.sflag [#allocation5], %s291_s20 }
  0x2b   : > { %p979_p1 = scmp.ne.s32.totalorder %s1294_s28, %s978_s17  ;;  %s982_s9 = sshll.u32 %s1080_s18, 4  ;;  %s983_s9 = int_to_ptr.vmem [resolvable:$false] %s982_s9 }
  0x2c   : > { %v824_v3 = vld.sshfl [vmem:[#allocation2] sm:$0x33 pattern:$0x76325410]  ;;  %p985_p5 = scmp.lt.s32.totalorder %s1294_s28, %s983_s9 }
  0x2d   : > { %378 = vrot.lane.b32.xlu1 %v824_v3, %s1077_s22  ;;  %490 = vst.msk [vmem:[#allocation2] sm:$0x3] %vm489_vm1, %v1206_v1  ;;  %324 = vrot.lane.b32.xlu0 %v824_v3, %s1078_s23  ;;  %v323_v4 = vcombine.high %v824_v3, %v824_v3  ;;  %v432_v13 = vld [vmem:[#allocation2 + $0x2] sm:$0x3]  ;;  %p980_p2 = pnand %p979_p1, %p1172_p3 }
  0x2e   : > { %v437_v18 = vsel %vm334_vm4, %v432_v13, 0 }
  0x2f   : > { %p981_p4 = pneg %p980_p2 }
  0x31   : > { %380 = vrot.lane.b32.xlu1 %v323_v4, %s1077_s22  ;;  %326 = vrot.lane.b32.xlu0 %v323_v4, %s1078_s23 }
  0x35   : > { %483 = vperm.xlu0 %976, %v480_v6  }
  0x9f   : > { %v379_v7 = vpop.permute.xlu1 %378  ;;  %v325_v8 = vpop.permute.xlu0 %324 }
  0xa3   : > { %v381_v9 = vpop.permute.xlu1 %380  ;;  %v327_v10 = vpop.permute.xlu0 %326 }
  0xa4   : > { %v329_v11 = vsel %vm328_vm2, %v325_v8, %v327_v10  ;;  %v383_v12 = vsel %vm330_vm3, %v379_v7, %v381_v9 }
  0xa5   : > { %v336_v14 = vsel %vm334_vm4, %v329_v11, 0  ;;  %v388_v15 = vsel %vm334_vm4, %v383_v12, 0 }
  0xa6   : > { %856 = vmatpush3.bf16.msra.mxu0 %v336_v14  ;;  %862 = vmatpush3.bf16.msra.mxu1 %v388_v15 }
  0xa7   : > { %867 = vmatprep.subr.bf16.mxu0 %v1075_v2  ;;  %873 = vmatprep.subr.bf16.mxu1 %v1075_v2 }
  0xa9   : > { %858 = vmatmul.mubr.msk.bf16.vlgmr.msra.gmra.mrb[0].mxu0 %vm330_vm3, %v823_v16  ;;  %864 = vmatmul.mubr.msk.bf16.vlgmr.msra.gmra.mrb[0].mxu1 %vm330_vm3, %v311_v17 }
  0xaa   : > { %868 = vmatpush3.bf16.msra.mxu0 %v437_v18  ;;  %869 = vmatprep.mubr.msk.bf16.mxu0 %vm1076_vm0, %v1075_v2 }
  0xab   : > { %875 = vmatprep.mubr.msk.bf16.mxu1 %vm1076_vm0, %v1075_v2  ;;  %879 = vmatprep.subr.bf16.mxu0 %v1075_v2 }
  0xb1   : > { %870 = vmatmul.mubr.msk.bf16.vlgmr.msra.gmra.mrb[4].mxu0 %vm330_vm3, %v827_v19 }
  0xb2   : > { %881 = vmatprep.mubr.msk.bf16.mxu0 %vm1076_vm0, %v1075_v2 }
  0xb4   : > { %v484_v30 = vpop.permute.xlu0 %483 }
 0x17c   : > { %v372_v20 = vpop.f32.mrb[0].mxu0  ;;  %v424_v21 = vpop.f32.mrb[0].mxu1 }
 0x17d   : > { %v425_v22 = vadd.f32 %v424_v21, %v372_v20  ;;  %v859_v23 = vpop.f32.mrb[1].mxu0  ;;  %v865_v24 = vpop.f32.mrb[1].mxu1 }
 0x17e   : > { %v375_v25 = vpop.f32.mrb[2].mxu0  ;;  %v427_v26 = vpop.f32.mrb[2].mxu1 }
 0x17f   : > { %v860_v27 = vpop.f32.mrb[3].mxu0  ;;  %v866_v28 = vpop.f32.mrb[3].mxu1 }
 0x184   : > { %v473_v29 = vpop.f32.mrb[4].mxu0 }
 0x185   : > { %v479_v31 = vadd.f32 %v473_v29, %v425_v22  ;;  %v871_v32 = vpop.f32.mrb[5].mxu0 }
 0x186   : > { %v476_v33 = vpop.f32.mrb[6].mxu0 }
 0x187   : > { %v486_v34 = vadd.f32 %v484_v30, %v479_v31  ;;  %v872_v35 = vpop.f32.mrb[7].mxu0 }
 0x189   : > { %v487_v36 = vmax.f32 %v486_v34, 0.0 }
 0x18b   : > { %v488_v37 = vpack.c.bf16 %v487_v36, %v487_v36 }
 0x18d   : > { %491 = vst [vmem:[#allocation3 + $0x4] sm:$0xf] %v488_v37 }
 0x194   : > { %v493_v38 = vld [vmem:[#allocation3] sm:$0xff] }
 0x195   : > { %664 = vst.msk [vmem:[#allocation3] sm:$0xf] %vm663_vm5, %v488_v37  ;;  %v830_v39 = vcombine.low %v493_v38, %v493_v38  ;;  %v831_v41 = vcombine.high %v493_v38, %v493_v38  ;;  %v607_v48 = vld [vmem:[#allocation3 + $0x4] sm:$0xf] }
 0x196   : > { %v612_v53 = vsel %vm510_vm6, %v607_v48, 0 }
 0x197   : > { %554 = vrot.lane.b32.xlu0 %v830_v39, %s1077_s22  ;;  %501 = vrot.lane.b32.xlu1 %v830_v39, %s1078_s23 }
 0x19b   : > { %658 = vperm.xlu0 %976, %v655_v40   ;;  %503 = vrot.lane.b32.xlu1 %v831_v41, %s1078_s23 }
 0x19f   : > { %556 = vrot.lane.b32.xlu1 %v831_v41, %s1077_s22  ;;  %s838_s22 = sshll.u32 %s733_s10, 7  ;;  %s984_s10 = scalar_lea.vmem %s983_s9, 256 }
 0x1a0   : > { %s1292_s16 = scalar_lea.hbm %s1356_s7, %s838_s22  ;;  %p986_p6 = scmp.lt.s32.totalorder %s984_s10, %s978_s17 }
 0x1a2   : > { %p987_p7 = por %p986_p6, %p985_p5 }
 0x1a3   : > { %669 = vperm.xlu1 %977, %v666_v42  }
 0x1a4   : > { %p988_p9 = pnand %p987_p7, %p981_p4 }
 0x209   : > { %v502_v43 = vpop.permute.xlu1 %501  ;;  %v555_v49 = vpop.permute.xlu0 %554 }
 0x20d   : > { %v504_v44 = vpop.permute.xlu1 %503 }
 0x20e   : > { %v505_v45 = vsel %vm328_vm2, %v502_v43, %v504_v44 }
 0x20f   : > { %v512_v46 = vsel %vm510_vm6, %v505_v45, 0 }
 0x210   : > { %874 = vmatpush3.bf16.msra.mxu1 %v512_v46 }
 0x211   : > { %v557_v50 = vpop.permute.xlu1 %556  ;;  %885 = vmatprep.subr.bf16.mxu1 %v1075_v2 }
 0x212   : > { %v558_v51 = vsel %vm330_vm3, %v555_v49, %v557_v50 }
 0x213   : > { %v563_v52 = vsel %vm510_vm6, %v558_v51, 0  ;;  %876 = vmatmul.mubr.msk.bf16.vlgmr.msra.gmra.mrb[4].mxu1 %vm506_vm7, %v829_v47 }
 0x214   : > { %880 = vmatpush3.bf16.msra.mxu0 %v563_v52  ;;  %886 = vmatpush3.bf16.msra.mxu1 %v612_v53 }
 0x215   : > { %887 = vmatprep.mubr.msk.bf16.mxu1 %vm1076_vm0, %v1075_v2  ;;  %891 = vmatprep.subr.bf16.mxu0 %v1075_v2 }
 0x217   : > { %882 = vmatmul.mubr.msk.bf16.vlgmr.msra.gmra.mrb[8].mxu0 %vm506_vm7, %v492_v54 }
 0x218   : > { %892 = vmatpush3.bf16.msra.mxu0 %v676_v55  ;;  %893 = vmatprep.mubr.msk.bf16.mxu0 %vm1076_vm0, %v1075_v2 }
 0x21a   : > { %v659_v4 = vpop.permute.xlu0 %658 }
 0x21b   : > { %888 = vmatmul.mubr.msk.bf16.vlgmr.msra.gmra.mrb[8].mxu1 %vm506_vm7, %v834_v56 }
 0x21f   : > { %894 = vmatmul.mubr.msk.bf16.vlgmr.msra.gmra.mrb[12].mxu0 %vm330_vm3, %v665_v57 }
 0x222   : > { %v670_v8 = vpop.permute.xlu1 %669 }
 0x2e6   : > { %v548_v58 = vpop.f32.mrb[4].mxu1 }
 0x2e7   : > { %v877_v59 = vpop.f32.mrb[5].mxu1 }
 0x2e8   : > { %v551_v60 = vpop.f32.mrb[6].mxu1 }
 0x2e9   : > { %v878_v61 = vpop.f32.mrb[7].mxu1 }
 0x2ea   : > { %v599_v62 = vpop.f32.mrb[8].mxu0 }
 0x2eb   : > { %v600_v63 = vadd.f32 %v599_v62, %v548_v58  ;;  %v883_v0 = vpop.f32.mrb[9].mxu0 }
 0x2ec   : > { %v602_v1 = vpop.f32.mrb[10].mxu0 }
 0x2ed   : > { %v884_v3 = vpop.f32.mrb[11].mxu0 }
 0x2ee   : > { %v648_v2 = vpop.f32.mrb[8].mxu1 }
 0x2ef   : > { %v654_v5 = vadd.f32 %v648_v2, %v600_v63  ;;  %v889_v6 = vpop.f32.mrb[9].mxu1 }
 0x2f0   : > { %v651_v7 = vpop.f32.mrb[10].mxu1 }
 0x2f1   : > { %v661_v9 = vadd.f32 %v659_v4, %v654_v5  ;;  %v890_v10 = vpop.f32.mrb[11].mxu1 }
 0x2f2   : > { %v712_v11 = vpop.f32.mrb[12].mxu0 }
 0x2f3   : > { %v662_v12 = vmax.f32 %v661_v9, 0.0  ;;  %v713_v13 = vadd.f32 %v712_v11, %v670_v8  ;;  %v895_v14 = vpop.f32.mrb[13].mxu0 }
 0x2f4   : > { %v715_v15 = vpop.f32.mrb[14].mxu0 }
 0x2f5   : > { %v718_v16 = vadd.f32 %v713_v13, %v662_v12  ;;  %v896_v17 = vpop.f32.mrb[15].mxu0 }
 0x2f7   : > { %v719_v18 = vmax.f32 %v718_v16, 0.0 }
 0x2f9   : > { %720 = vst [vmem:[%s293_s12] sm:$0xff] %v719_v18 }
 0x2fa   : > { %991 = shalt.err (!%p988_p9)
}
 0x2fb   : > { %s992_s12 = scalar_lea.hbm %s1292_s16, 128  ;;  %s996_s22 = scalar_lea.hbm %s1356_s7, 768 }
 0x2fc   : > { %p993_p10 = scmp.ne.s32.totalorder %s1292_s16, %s992_s12  ;;  %p997_p13 = scmp.lt.u32.totalorder %s1292_s16, %s1356_s7 }
 0x2fd   : > { %p998_p0 = scmp.lt.u32.totalorder %s996_s22, %s992_s12  ;;  %p1000_p2 = scmp.lt.u32.totalorder %s992_s12, %s1292_s16 }
 0x2fe   : > { %p994_p11 = pnand %p993_p10, %p1172_p3 }
 0x2ff   : > { %p999_p1 = por %p998_p0, %p997_p13 }
 0x300   : > { %p995_p12 = pneg %p994_p11 }
 0x301   : > { %p1001_p4 = por %p1000_p2, %p999_p1 }
 0x303   : > { %p1002_p5 = pnand %p1001_p4, %p995_p12 }
 0x305   : > { %1005 = shalt.err (!%p1002_p5)
}
 0x306   : > { %899 = dma.vmem_to_hbm [thread:$0]  (%p1172_p3), %s1294_s28, 128, %s1292_s16, %s722_s27  }
 0x307 PF: > { %p905_p6 = scmp.ge.s32.totalorder %s1072_s8, 2  ;;  %s749_s17 = sand.u32 1, %s1044_s24  }
 0x308   : > { %s750_s18 = scalar_lea.sflag [#allocation5], %s749_s17 }
 0x309   : > { %p902_p7 = pnand %p905_p6, %p1181_p8 }
 0x30b   : > { %1039 = dma.done.wait (!%p902_p7), %s750_s18, 128  }
 0x30c   : > { %1041 = vsyncadd (!%p902_p7), %s750_s18, 4294967168  ;;  %s20_s8 = sadd.s32 1, %s1072_s8   ;;  %s1361_s14 = sld [smem:[#allocation7_spill]] }
 0x30d   : > { %p17_p9 = scmp.ge.s32.totalorder %s20_s8, 8   ;;  %s1362_s24 = smov %s1048_s25 }
 0x30e   : > { %s1363_s25 = smov %s1052_s26  ;;  %s1364_s26 = smov %s1190_s19 }
 0x30f   : > { %s1365_s27 = smov %s1064_s29  ;;  %s1366_s28 = smov %s1068_s30 }
 0x310   : > { %s1367_s29 = smov %s1370_s11  ;;  %19 = sbr.rel (!%p17_p9) target bundleno = 5 (0x5), region = 91 }
 0x312   : > { %s1368_s30 = smov %s1361_s14 }
 0x317   :  { %755 = vsyncpa [#allocation5], 1 }
 0x318   :  { %757 = vsyncpa [#allocation5 + $0x1], 1 }

</bundles_post_ra>
